<compile_context>
chip_gen: v7x
topology: tpu7x:2x2x1
jax: 0.10.0
libtpu: 0.0.40
codegen_flags: <defaults>
</compile_context>

<pallas_src>
import functools

import jax
import jax.numpy as jnp
from jax import lax
from jax.experimental import pallas as pl
from jax.experimental.pallas import tpu as pltpu


def _round_up(x, m):
    return ((x + m - 1) // m) * m


def _tpu_generation():
    """Best-effort TPU generation sniff: 7 for v7x, 6 for v6e, else 5 (v5e/older/unknown)."""
    try:
        kind = jax.devices()[0].device_kind.lower()
    except Exception:
        return 5
    if "v7" in kind:
        return 7
    if "v6" in kind:
        return 6
    return 5


# Per-grid-step VMEM working-set budget (double-buffered input DMA at native
# itemsize plus f32 compute temporaries).  v5e's scoped-VMEM default is 16 MiB,
# v6e/v7x's is 32 MiB; v7x additionally gets an explicit vmem_limit_bytes raise
# (64 MiB physical per TensorCore) so it can run ~2.5 MiB-per-input tiles.
_STEP_BUDGET_BYTES = {7: 40 << 20, 6: 24 << 20, 5: 12 << 20}
_VMEM_LIMIT_BYTES = {7: 48 << 20, 6: None, 5: None}


def _choose_tile_rows(batch, d_vec, d_unclip, itemsize, target_step_bytes):
    """Largest batch tile (multiple of 8) whose per-step working set fits.

    Per-row working set = all four input tiles double-buffered at their native
    itemsize (the DMA pipeline) plus ~2 live f32 temporaries per element inside
    the kernel body.  Dtype-aware: bf16 inputs get proportionally larger tiles.
    No divisor hunt: the grid uses pl.cdiv and the last tile is masked in-kernel.
    """
    row_elems = 2 * d_vec + 2 * d_unclip
    row_bytes = row_elems * (2 * itemsize + 8)
    rows = max(8, int(target_step_bytes // row_bytes) // 8 * 8)
    return int(min(rows, _round_up(batch, 8)))


def _rote_mse_kernel(a_ref, b_ref, u_ref, p_ref, out_ref, *,
                     tile_rows, n_valid_rows, needs_mask):
    """One independent grid step over a batch tile.

    a_ref, b_ref : (tile_rows, D)   init_img_vec / next_img_vec tiles
    u_ref, p_ref : (tile_rows, Du)  init_unclip / pred_unclip tiles
    out_ref      : (1, 8, 128)      per-tile partial sums; sublane 0 = rote,
                                    sublane 1 = mse (single full-vreg store).

    The last batch tile may read rows past the true batch (no jnp.pad in the
    wrapper); those rows are dropped with a per-row jnp.where select so even
    NaN/Inf garbage in the out-of-bounds rows cannot poison the sums.
    """
    step = pl.program_id(0)

    a = a_ref[...].astype(jnp.float32)
    b = b_ref[...].astype(jnp.float32)
    u = u_ref[...].astype(jnp.float32)
    p = p_ref[...].astype(jnp.float32)

    # Lane-axis (per-row) reductions first; masking afterwards is O(tile_rows).
    dot = jnp.sum(a * b, axis=-1, keepdims=True)        # (rows, 1)
    na = jnp.sum(a * a, axis=-1, keepdims=True)
    nb = jnp.sum(b * b, axis=-1, keepdims=True)
    one_minus_cos = 1.0 - dot * lax.rsqrt(na * nb + 1e-8)

    diff = p - u
    sq_row = jnp.sum(diff * diff, axis=-1, keepdims=True)  # (rows, 1)

    if needs_mask:
        row_ids = step * tile_rows + lax.broadcasted_iota(
            jnp.int32, (tile_rows, 1), 0)
        valid = row_ids < n_valid_rows
        one_minus_cos = jnp.where(valid, one_minus_cos, 0.0)
        sq_row = jnp.where(valid, sq_row, 0.0)

    rote_partial = jnp.sum(one_minus_cos)
    mse_partial = jnp.sum(sq_row)

    # Pack both partials into one (1, 8, 128) block: rote on sublane 0,
    # mse on sublane 1, zeros elsewhere -> one unmasked full-vreg store.
    sub = lax.broadcasted_iota(jnp.int32, out_ref.shape, 1)
    out_ref[...] = (jnp.where(sub == 0, rote_partial, 0.0)
                    + jnp.where(sub == 1, mse_partial, 0.0))


def rote_mse_loss_pallas(init_img_vec, next_img_vec, init_unclip, pred_unclip,
                         *, tile_rows=None):
    """Returns the base (rote, mse) scalars, computed in one Pallas launch."""
    B, D = init_img_vec.shape
    Bu, Du = init_unclip.shape
    assert B == Bu, "batch dims must match"

    gen = _tpu_generation()
    itemsize = max(jnp.dtype(x.dtype).itemsize
                   for x in (init_img_vec, next_img_vec,
                             init_unclip, pred_unclip))
    if tile_rows is None:
        tile_rows = _choose_tile_rows(B, D, Du, itemsize,
                                      _STEP_BUDGET_BYTES[gen])

    num_tiles = pl.cdiv(B, tile_rows)
    needs_mask = (B % tile_rows) != 0   # last tile reads OOB rows -> mask them

    kernel = functools.partial(
        _rote_mse_kernel,
        tile_rows=tile_rows, n_valid_rows=B, needs_mask=needs_mask)

    vec_spec = pl.BlockSpec((tile_rows, D), lambda i: (i, 0))
    unclip_spec = pl.BlockSpec((tile_rows, Du), lambda i: (i, 0))
    out_spec = pl.BlockSpec((1, 8, 128), lambda i: (i, 0, 0))
    out_shape = jax.ShapeDtypeStruct((num_tiles, 8, 128), jnp.float32)

    cost = pl.CostEstimate(
        flops=B * (6 * D + 3 * Du + 8),
        transcendentals=B,  # one rsqrt per row
        bytes_accessed=(init_img_vec.nbytes + next_img_vec.nbytes
                        + init_unclip.nbytes + pred_unclip.nbytes
                        + num_tiles * 8 * 128 * 4),
    )

    def build(dim_sems):
        params = dict(dimension_semantics=dim_sems)
        if _VMEM_LIMIT_BYTES[gen] is not None:
            params["vmem_limit_bytes"] = _VMEM_LIMIT_BYTES[gen]
        return pl.pallas_call(
            kernel,
            out_shape=out_shape,
            grid_spec=pltpu.PrefetchScalarGridSpec(
                num_scalar_prefetch=0,
                grid=(num_tiles,),
                in_specs=[vec_spec, vec_spec, unclip_spec, unclip_spec],
                out_specs=out_spec,
            ),
            compiler_params=pltpu.CompilerParams(**params),
            cost_estimate=cost,
        )

    # v7x has 2 TensorCores; plain "parallel" does not shard the grid across
    # them, only CORE_PARALLEL changes codegen.  Guarded by device detection,
    # with a plain "parallel" fallback so v5e/v6e (and any lowering surprise)
    # run the single-core path cleanly.
    semantics_options = []
    if gen == 7 and num_tiles >= 2:
        semantics_options.append((pltpu.CORE_PARALLEL,))
    semantics_options.append(("parallel",))

    partials = None
    last_err = None
    for sems in semantics_options:
        try:
            partials = build(sems)(init_img_vec, next_img_vec,
                                   init_unclip, pred_unclip)
            break
        except Exception as err:   # fall back to plain "parallel"
            last_err = err
    if partials is None:
        raise last_err

    # Tiny final reduction (num_tiles scalars) + mean normalization in JAX.
    rote = jnp.sum(partials[:, 0, 0]) / B
    mse = jnp.sum(partials[:, 1, 0]) / (B * Du)
    return rote, mse


def make_loss(scale):
    """Builds one member loss (a deterministic per-loss scale stands in for the
    different loss modules PyTorch would hold in `set_losses`).

    Accepts an optional precomputed `base=(rote, mse)` so SumLosses can share a
    single Pallas launch across all member losses.  Called standalone, it
    launches the kernel itself.
    """
    def loss_fn(init_img_vec, next_img_vec, init_unclip, pred_unclip,
                *, base=None):
        if base is None:
            base = rote_mse_loss_pallas(
                init_img_vec, next_img_vec, init_unclip, pred_unclip)
        rote, mse = base
        return scale * rote, scale * mse
    return loss_fn


class SumLosses:
    """JAX/Pallas port of custestimate.testlosses.SumLosses.forward."""

    def __init__(self, set_losses, set_weights=None):
        self.set_losses = set_losses
        # `is None` (not falsiness) so an explicit empty list is respected.
        self.set_weights = ([1.0 for _ in range(len(set_losses))]
                            if set_weights is None else set_weights)

    def __call__(self, init_img_vec, next_img_vec, init_unclip, pred_unclip):
        # Single kernel launch: every member loss here is a scale of the same
        # (rote, mse) pair, so the base is computed once and shared.
        # TODO(synk): if member losses ever diverge in formula, drop `base=`
        # and let each loss launch its own kernel again.
        base = rote_mse_loss_pallas(
            init_img_vec, next_img_vec, init_unclip, pred_unclip)
        mse_loss = 0.0
        rote_loss = 0.0
        for i, loss in enumerate(self.set_losses):
            rote, mse = loss(init_img_vec, next_img_vec, init_unclip,
                             pred_unclip, base=base)
            rote_loss += self.set_weights[i] * rote
            mse_loss += self.set_weights[i] * mse
        return (rote_loss, mse_loss)


def _reference(init_img_vec, next_img_vec, init_unclip, pred_unclip,
               scales, weights):
    """Plain-JAX reference for correctness checking."""
    a = init_img_vec.astype(jnp.float32)
    b = next_img_vec.astype(jnp.float32)
    u = init_unclip.astype(jnp.float32)
    p = pred_unclip.astype(jnp.float32)
    dot = jnp.sum(a * b, axis=-1)
    na = jnp.sum(a * a, axis=-1)
    nb = jnp.sum(b * b, axis=-1)
    cos = dot / jnp.sqrt(na * nb + 1e-8)
    rote = jnp.mean(1.0 - cos)
    mse = jnp.mean((p - u) ** 2)
    rote_total = sum(w * s * rote for w, s in zip(weights, scales))
    mse_total = sum(w * s * mse for w, s in zip(weights, scales))
    return rote_total, mse_total


if __name__ == "__main__":
    key = jax.random.PRNGKey(0)

    scales = [1.0, 0.5]             # two synthetic member losses
    weights = [1.0, 2.0]            # set_weights
    module = SumLosses([make_loss(s) for s in scales], set_weights=weights)

    def run_case(batch, feat, dtype, tol, forced_tile_rows=None):
        ks = jax.random.split(jax.random.fold_in(key, batch), 4)
        mk = lambda k: jax.random.normal(
            k, (batch, feat), dtype=jnp.float32).astype(dtype)
        a, b, u, p = (mk(k) for k in ks)
        if forced_tile_rows is None:
            rote, mse = module(a, b, u, p)
        else:
            # Directly exercise the multi-tile + out-of-bounds-masked path.
            base = rote_mse_loss_pallas(a, b, u, p, tile_rows=forced_tile_rows)
            rote = sum(w * s * base[0] for w, s in zip(weights, scales))
            mse = sum(w * s * base[1] for w, s in zip(weights, scales))
        rote = jax.block_until_ready(rote)
        mse = jax.block_until_ready(mse)
        ref_rote, ref_mse = _reference(a, b, u, p, scales, weights)
        assert jnp.allclose(rote, ref_rote, rtol=tol, atol=tol), (rote, ref_rote)
        assert jnp.allclose(mse, ref_mse, rtol=tol, atol=tol), (mse, ref_mse)

    # (batch, feature) with feature on the lane axis.
    run_case(16, 128, jnp.float32, 1e-5)                        # tile-divisible
    run_case(20, 128, jnp.float32, 1e-5)                        # OOB last rows, masked
    run_case(20, 128, jnp.float32, 1e-5, forced_tile_rows=8)    # multi-tile + mask
    run_case(20, 128, jnp.bfloat16, 2e-2)                       # bf16 inputs, f32 math

    print("KERNEL_OK")
</pallas_src>

<mosaic_0001>
module attributes {stable_mosaic.version = 11 : i64} {
  func.func @_rote_mse_kernel(%arg0: i32, %arg1: memref<16x128xf32, #tpu.memory_space<vmem>>, %arg2: memref<16x128xf32, #tpu.memory_space<vmem>>, %arg3: memref<16x128xf32, #tpu.memory_space<vmem>>, %arg4: memref<16x128xf32, #tpu.memory_space<vmem>>, %arg5: memref<1x8x128xf32, #tpu.memory_space<vmem>>) attributes {dimension_semantics = [#tpu.dimension_semantics<parallel>], iteration_bounds = array<i64: 1>, scalar_prefetch = 0 : i64, scratch_operands = 0 : i64, tpu.core_type = #tpu.core_type<tc>, window_params = [{transform_indices = @transform_0, window_bounds = array<i64: 16, 128>}, {transform_indices = @transform_1, window_bounds = array<i64: 16, 128>}, {transform_indices = @transform_2, window_bounds = array<i64: 16, 128>}, {transform_indices = @transform_3, window_bounds = array<i64: 16, 128>}, {transform_indices = @transform_4, window_bounds = array<i64: 1, 8, 128>}]} {
    %c0 = arith.constant 0 : index
    %c0_0 = arith.constant 0 : index
    %0 = vector.load %arg1[%c0, %c0_0] : memref<16x128xf32, #tpu.memory_space<vmem>>, vector<16x128xf32>
    %c0_1 = arith.constant 0 : index
    %c0_2 = arith.constant 0 : index
    %1 = vector.load %arg2[%c0_1, %c0_2] : memref<16x128xf32, #tpu.memory_space<vmem>>, vector<16x128xf32>
    %c0_3 = arith.constant 0 : index
    %c0_4 = arith.constant 0 : index
    %2 = vector.load %arg3[%c0_3, %c0_4] : memref<16x128xf32, #tpu.memory_space<vmem>>, vector<16x128xf32>
    %c0_5 = arith.constant 0 : index
    %c0_6 = arith.constant 0 : index
    %3 = vector.load %arg4[%c0_5, %c0_6] : memref<16x128xf32, #tpu.memory_space<vmem>>, vector<16x128xf32>
    %4 = arith.mulf %0, %1 : vector<16x128xf32>
    %cst = arith.constant dense<0.000000e+00> : vector<16xf32>
    %5 = vector.multi_reduction <add>, %4, %cst [1] : vector<16x128xf32> to vector<16xf32>
    %6 = vector.shape_cast %5 : vector<16xf32> to vector<16x1xf32>
    %7 = arith.mulf %0, %0 : vector<16x128xf32>
    %cst_7 = arith.constant dense<0.000000e+00> : vector<16xf32>
    %8 = vector.multi_reduction <add>, %7, %cst_7 [1] : vector<16x128xf32> to vector<16xf32>
    %9 = vector.shape_cast %8 : vector<16xf32> to vector<16x1xf32>
    %10 = arith.mulf %1, %1 : vector<16x128xf32>
    %cst_8 = arith.constant dense<0.000000e+00> : vector<16xf32>
    %11 = vector.multi_reduction <add>, %10, %cst_8 [1] : vector<16x128xf32> to vector<16xf32>
    %12 = vector.shape_cast %11 : vector<16xf32> to vector<16x1xf32>
    %13 = arith.mulf %9, %12 : vector<16x1xf32>
    %cst_9 = arith.constant 9.99999993E-9 : f32
    %14 = vector.broadcast %cst_9 : f32 to vector<16x1xf32>
    %15 = arith.addf %13, %14 : vector<16x1xf32>
    %16 = math.rsqrt %15 : vector<16x1xf32>
    %17 = arith.mulf %6, %16 : vector<16x1xf32>
    %cst_10 = arith.constant 1.000000e+00 : f32
    %18 = vector.broadcast %cst_10 : f32 to vector<16x1xf32>
    %19 = arith.subf %18, %17 : vector<16x1xf32>
    %20 = arith.subf %3, %2 : vector<16x128xf32>
    %21 = arith.mulf %20, %20 : vector<16x128xf32>
    %cst_11 = arith.constant dense<0.000000e+00> : vector<16xf32>
    %22 = vector.multi_reduction <add>, %21, %cst_11 [1] : vector<16x128xf32> to vector<16xf32>
    %23 = vector.shape_cast %22 : vector<16xf32> to vector<16x1xf32>
    %24 = vector.shape_cast %19 : vector<16x1xf32> to vector<1x16x1xf32>
    %cst_12 = arith.constant dense<0.000000e+00> : vector<1xf32>
    %25 = vector.multi_reduction <add>, %24, %cst_12 [1, 2] : vector<1x16x1xf32> to vector<1xf32>
    %26 = vector.shape_cast %25 : vector<1xf32> to vector<1x1x1xf32>
    %27 = vector.extract %26[0, 0, 0] : f32 from vector<1x1x1xf32>
    %28 = vector.shape_cast %23 : vector<16x1xf32> to vector<1x16x1xf32>
    %cst_13 = arith.constant dense<0.000000e+00> : vector<1xf32>
    %29 = vector.multi_reduction <add>, %28, %cst_13 [1, 2] : vector<1x16x1xf32> to vector<1xf32>
    %30 = vector.shape_cast %29 : vector<1xf32> to vector<1x1x1xf32>
    %31 = vector.extract %30[0, 0, 0] : f32 from vector<1x1x1xf32>
    %32 = tpu.iota {dimensions = array<i32: 1>} : vector<1x8x128xi32>
    %c0_i32 = arith.constant 0 : i32
    %33 = vector.broadcast %c0_i32 : i32 to vector<1x8x128xi32>
    %34 = arith.cmpi eq, %32, %33 : vector<1x8x128xi32>
    %cst_14 = arith.constant 0.000000e+00 : f32
    %35 = vector.broadcast %27 : f32 to vector<1x8x128xf32>
    %36 = vector.broadcast %cst_14 : f32 to vector<1x8x128xf32>
    %37 = arith.select %34, %35, %36 : vector<1x8x128xi1>, vector<1x8x128xf32>
    %c1_i32 = arith.constant 1 : i32
    %38 = vector.broadcast %c1_i32 : i32 to vector<1x8x128xi32>
    %39 = arith.cmpi eq, %32, %38 : vector<1x8x128xi32>
    %cst_15 = arith.constant 0.000000e+00 : f32
    %40 = vector.broadcast %31 : f32 to vector<1x8x128xf32>
    %41 = vector.broadcast %cst_15 : f32 to vector<1x8x128xf32>
    %42 = arith.select %39, %40, %41 : vector<1x8x128xi1>, vector<1x8x128xf32>
    %43 = arith.addf %37, %42 : vector<1x8x128xf32>
    %c0_16 = arith.constant 0 : index
    %c0_17 = arith.constant 0 : index
    %c0_18 = arith.constant 0 : index
    %44 = vector.load %arg5[%c0_16, %c0_17, %c0_18] : memref<1x8x128xf32, #tpu.memory_space<vmem>>, vector<1x8x128xf32>
    tpu.vector_store %arg5[%c0_16, %c0_17, %c0_18], %43 {strides = array<i32>} : memref<1x8x128xf32, #tpu.memory_space<vmem>>, vector<1x8x128xf32>,
    return
  }
  func.func @transform_0(%arg0: i32) -> (i32, i32) {
    %c0_i32 = arith.constant 0 : i32
    %c0_i32_0 = arith.constant 0 : i32
    return %arg0, %c0_i32 : i32, i32
  }
  func.func @transform_1(%arg0: i32) -> (i32, i32) {
    %c0_i32 = arith.constant 0 : i32
    %c0_i32_0 = arith.constant 0 : i32
    return %arg0, %c0_i32 : i32, i32
  }
  func.func @transform_2(%arg0: i32) -> (i32, i32) {
    %c0_i32 = arith.constant 0 : i32
    %c0_i32_0 = arith.constant 0 : i32
    return %arg0, %c0_i32 : i32, i32
  }
  func.func @transform_3(%arg0: i32) -> (i32, i32) {
    %c0_i32 = arith.constant 0 : i32
    %c0_i32_0 = arith.constant 0 : i32
    return %arg0, %c0_i32 : i32, i32
  }
  func.func @transform_4(%arg0: i32) -> (i32, i32, i32) {
    %c0_i32 = arith.constant 0 : i32
    %c0_i32_0 = arith.constant 0 : i32
    %c0_i32_1 = arith.constant 0 : i32
    return %arg0, %c0_i32, %c0_i32_0 : i32, i32, i32
  }
}

</mosaic_0001>

<bundles_post_ra>
// kernel: tpu_custom_call.1
= control target key start
LH: loop header
LB: loop body
LE: loop exit
PB: predicated region body
PF: predicated region fallthrough
CT: control target
= control target key end

     0   :  { %9 = vsyncpa [#allocation3], 0  ;;  %s420_s0 = inlined_call_operand.hbm [shape: f32[16,128], index: 0, kind: input, shape index: {}]   ;;  %s421_s1 = inlined_call_operand.hbm [shape: f32[16,128], index: 1, kind: input, shape index: {}]   ;;  %s422_s2 = inlined_call_operand.hbm [shape: f32[16,128], index: 2, kind: input, shape index: {}]   ;;  %s423_s3 = inlined_call_operand.hbm [shape: f32[16,128], index: 3, kind: input, shape index: {}]   ;;  %s424_s4 = inlined_call_operand.hbm [shape: f32[1,8,128], index: 4, kind: output, shape index: {}]  }
   0x1   :  { %10 = vsyncpa [#allocation6], 0 }
   0x2   :  { %11 = vsyncpa [#allocation9], 0 }
   0x3   :  { %12 = vsyncpa [#allocation4], 0  ;;  %s302_s15 = smov [#allocation5]   ;;  %s303_s17 = smov [#allocation2]  }
   0x4   :  { %s30_s16 = sshll.u32 %s302_s15, 4  ;;  %s18_s18 = sshll.u32 %s303_s17, 4  ;;  %s31_s16 = int_to_ptr.vmem [resolvable:$true] %s30_s16  ;;  %s334_s18 = int_to_ptr.vmem [resolvable:$true] %s18_s18 }
   0x5   :  { %s184_s21 = scalar_lea.hbm %s421_s1, 256 }
   0x6   :  { %p185_p0 = scmp.ne.s32.totalorder %s421_s1, %s184_s21  ;;  %p188_p1 = scmp.lt.u32.totalorder %s184_s21, %s421_s1 }
   0x8   :  { %p190_p2 = pnand %p188_p1, %p185_p0 }
   0xa   :  { %193 = shalt.err (!%p190_p2)
}
   0xb   :  { %s194_s26 = scalar_lea.vmem %s31_s16, 256  ;;  %p199_p4 = scmp.lt.s32.totalorder %s31_s16, %s31_s16 }
   0xc   :  { %p195_p3 = scmp.ne.s32.totalorder %s31_s16, %s194_s26  ;;  %p200_p5 = scmp.lt.s32.totalorder %s194_s26, %s194_s26 }
   0xe   :  { %p201_p6 = por %p200_p5, %p199_p4 }
  0x10   :  { %p202_p7 = pnand %p201_p6, %p195_p3 }
  0x12   :  { %205 = shalt.err (!%p202_p7)
}
  0x13   :  { %s304_s27 = smov 128   ;;  %s305_s28 = smov 8  }
  0x14   :  { %36 = dma.hbm_to_vmem [thread:$0]  %s421_s1, 256, %s31_s16, [#allocation6], %s304_s27, %s304_s27, %s305_s28  }
  0x15   :  { %s206_s7 = scalar_lea.hbm %s420_s0, 256 }
  0x16   :  { %p207_p8 = scmp.ne.s32.totalorder %s420_s0, %s206_s7  ;;  %p210_p9 = scmp.lt.u32.totalorder %s206_s7, %s420_s0 }
  0x18   :  { %p212_p10 = pnand %p210_p9, %p207_p8 }
  0x1a   :  { %215 = shalt.err (!%p212_p10)
}
  0x1b   :  { %s216_s12 = scalar_lea.vmem %s334_s18, 256  ;;  %p221_p12 = scmp.lt.s32.totalorder %s334_s18, %s334_s18 }
  0x1c   :  { %p217_p11 = scmp.ne.s32.totalorder %s334_s18, %s216_s12  ;;  %p222_p13 = scmp.lt.s32.totalorder %s216_s12, %s216_s12 }
  0x1e   :  { %p223_p0 = por %p222_p13, %p221_p12 }
  0x20   :  { %p224_p1 = pnand %p223_p0, %p217_p11 }
  0x22   :  { %227 = shalt.err (!%p224_p1)
}
  0x23   :  { %24 = dma.hbm_to_vmem [thread:$0]  %s420_s0, 256, %s334_s18, [#allocation3], %s304_s27, %s304_s27, %s305_s28  }
  0x24   :  { %s306_s14 = smov [#allocation7]   ;;  %s307_s16 = smov [#allocation8]  }
  0x25   :  { %s42_s15 = sshll.u32 %s306_s14, 4  ;;  %s54_s17 = sshll.u32 %s307_s16, 4  ;;  %s43_s15 = int_to_ptr.vmem [resolvable:$true] %s42_s15  ;;  %s371_s17 = int_to_ptr.vmem [resolvable:$true] %s54_s17 }
  0x26   :  { %s228_s21 = scalar_lea.hbm %s422_s2, 256 }
  0x27   :  { %p229_p2 = scmp.ne.s32.totalorder %s422_s2, %s228_s21  ;;  %p232_p3 = scmp.lt.u32.totalorder %s228_s21, %s422_s2 }
  0x29   :  { %p234_p4 = pnand %p232_p3, %p229_p2 }
  0x2b   :  { %237 = shalt.err (!%p234_p4)
}
  0x2c   :  { %s238_s0 = scalar_lea.vmem %s43_s15, 256  ;;  %p243_p6 = scmp.lt.s32.totalorder %s43_s15, %s43_s15 }
  0x2d   :  { %p239_p5 = scmp.ne.s32.totalorder %s43_s15, %s238_s0  ;;  %p244_p7 = scmp.lt.s32.totalorder %s238_s0, %s238_s0 }
  0x2f   :  { %p245_p8 = por %p244_p7, %p243_p6 }
  0x31   :  { %p246_p9 = pnand %p245_p8, %p239_p5 }
  0x33   :  { %249 = shalt.err (!%p246_p9)
}
  0x34   :  { %48 = dma.hbm_to_vmem [thread:$0]  %s422_s2, 256, %s43_s15, [#allocation6], %s304_s27, %s304_s27, %s305_s28  }
  0x35   :  { %s250_s5 = scalar_lea.hbm %s423_s3, 256 }
  0x36   :  { %p251_p10 = scmp.ne.s32.totalorder %s423_s3, %s250_s5  ;;  %p254_p11 = scmp.lt.u32.totalorder %s250_s5, %s423_s3 }
  0x38   :  { %p256_p12 = pnand %p254_p11, %p251_p10 }
  0x3a   :  { %259 = shalt.err (!%p256_p12)
}
  0x3b   :  { %s260_s10 = scalar_lea.vmem %s371_s17, 256  ;;  %p265_p0 = scmp.lt.s32.totalorder %s371_s17, %s371_s17 }
  0x3c   :  { %p261_p13 = scmp.ne.s32.totalorder %s371_s17, %s260_s10  ;;  %p266_p1 = scmp.lt.s32.totalorder %s260_s10, %s260_s10 }
  0x3e   :  { %p267_p2 = por %p266_p1, %p265_p0 }
  0x40   :  { %p268_p3 = pnand %p267_p2, %p261_p13 }
  0x42   :  { %271 = shalt.err (!%p268_p3)
}
  0x43   :  { %60 = dma.hbm_to_vmem [thread:$0]  %s423_s3, 256, %s371_s17, [#allocation9], %s304_s27, %s304_s27, %s305_s28  }
  0x44   :  { %294 = dma.done.wait [#allocation3], 256  }
  0x45   :  { %295 = vsyncadd [#allocation3], 4294967040 }
  0x46   :  { %296 = dma.done.wait [#allocation6], 512  }
  0x47   :  { %297 = vsyncadd [#allocation6], 4294966784 }
  0x48   :  { %298 = dma.done.wait [#allocation9], 256  }
  0x49   :  { %299 = vsyncadd [#allocation9], 4294967040  ;;  %v75_v0 = vld [vmem:[#allocation5] sm:$0xff]  ;;  %v73_v1 = vld [vmem:[#allocation2] sm:$0xff]  ;;  %vm117_vm0 = vcmask 7168   ;;  %v142_v56 = vlaneseq  ;;  %s308_s28 = smov [#allocation10]  }
  0x4a   :  { %v76_v2 = vld [vmem:[#allocation5 + $0x8] sm:$0xff]  ;;  %v93_v3 = vmul.f32 %v75_v0, %v75_v0  ;;  %v87_v4 = vmul.f32 %v73_v1, %v73_v1  ;;  %v74_v5 = vld [vmem:[#allocation2 + $0x8] sm:$0xff]  ;;  %v77_v10 = vld [vmem:[#allocation7] sm:$0xff]  ;;  %v81_v12 = vmul.f32 %v75_v0, %v73_v1  ;;  %s158_s12 = sshll.u32 %s308_s28, 4  ;;  %s159_s12 = int_to_ptr.vmem [resolvable:$true] %s158_s12 }
  0x4b   :  { %v94_v6 = vmul.f32 %v76_v2, %v76_v2  ;;  %v88_v7 = vmul.f32 %v74_v5, %v74_v5  ;;  %v78_v8 = vld [vmem:[#allocation7 + $0x8] sm:$0xff]  ;;  %v80_v9 = vld [vmem:[#allocation8 + $0x8] sm:$0xff]  ;;  %v79_v11 = vld [vmem:[#allocation8] sm:$0xff]  ;;  %v82_v13 = vmul.f32 %v76_v2, %v74_v5  ;;  %v143_v57 = vshrl.u32 %v142_v56, 7  ;;  %s272_s1 = scalar_lea.vmem %s159_s12, 128  ;;  %p277_p5 = scmp.lt.s32.totalorder %s159_s12, %s159_s12 }
  0x4c   :  { %95 = vadd.xlane.f32.xlu1 %v93_v3  ;;  %89 = vadd.xlane.f32.xlu0 %v87_v4  ;;  %v110_v14 = vsub.f32 %v80_v9, %v78_v8  ;;  %v109_v15 = vsub.f32 %v79_v11, %v77_v10  ;;  %p273_p4 = scmp.ne.s32.totalorder %s159_s12, %s272_s1  ;;  %p278_p6 = scmp.lt.s32.totalorder %s272_s1, %s272_s1 }
  0x4d   :  { %vm144_vm1 = vcmp.eq.s32.totalorder %v143_v57, 0  ;;  %vm147_vm2 = vcmp.eq.s32.totalorder %v143_v57, 1 }
  0x4e   :  { %v112_v16 = vmul.f32 %v110_v14, %v110_v14  ;;  %v111_v17 = vmul.f32 %v109_v15, %v109_v15  ;;  %p279_p7 = por %p278_p6, %p277_p5 }
  0x50   :  { %97 = vadd.xlane.f32.xlu1 %v94_v6  ;;  %91 = vadd.xlane.f32.xlu0 %v88_v7  ;;  %p280_p8 = pnand %p279_p7, %p273_p4 }
  0x54   :  { %85 = vadd.xlane.f32.xlu1 %v82_v13  ;;  %83 = vadd.xlane.f32.xlu0 %v81_v12 }
  0x58   :  { %115 = vadd.xlane.f32.xlu1 %v112_v16  ;;  %113 = vadd.xlane.f32.xlu0 %v111_v17 }
  0xd9   :  { %v96_v18 = vpop.xlane.xlu1 %95  ;;  %v90_v19 = vpop.xlane.xlu0 %89 }
  0xda   :  { %v99_v20 = vmul.f32 %v96_v18, %v90_v19 }
  0xdc   :  { %v101_v21 = vadd.f32 1e-08, %v99_v20 }
  0xdd   :  { %v98_v22 = vpop.xlane.xlu1 %97  ;;  %v92_v23 = vpop.xlane.xlu0 %91 }
  0xde   :  { %180 = vrsqrt.f32 %v101_v21  ;;  %v100_v24 = vmul.f32 %v98_v22, %v92_v23 }
  0xe0   :  { %v102_v25 = vadd.f32 1e-08, %v100_v24 }
  0xe1   :  { %v86_v26 = vpop.xlane.xlu1 %85  ;;  %v84_v27 = vpop.xlane.xlu0 %83 }
  0xe2   :  { %182 = vrsqrt.f32 %v102_v25 }
  0xe5   :  { %v116_v28 = vpop.xlane.xlu1 %115  ;;  %v114_v29 = vpop.xlane.xlu0 %113 }
  0xe6   :  { %v131_v30 = vsel %vm117_vm0, %v116_v28, 0.0  ;;  %v130_v31 = vsel %vm117_vm0, %v114_v29, 0.0 }
  0xe7   :  { %v132_v32 = vadd.f32 %v131_v30, %v130_v31 }
  0xe8   :  { %v181_v33 = vpop.eup %180 }
  0xe9   :  { %v105_v34 = vmul.f32 %v181_v33, %v84_v27  ;;  %133 = vadd.xlane.f32.xlu1 %v132_v32 }
  0xeb   :  { %v107_v37 = vsub.f32 1.0, %v105_v34 }
  0xec   :  { %v183_v35 = vpop.eup %182 }
  0xed   :  { %v106_v36 = vmul.f32 %v183_v35, %v86_v26  ;;  %v118_v39 = vsel %vm117_vm0, %v107_v37, 0.0 }
  0xef   :  { %v108_v38 = vsub.f32 1.0, %v106_v36 }
  0xf1   :  { %v119_v40 = vsel %vm117_vm0, %v108_v38, 0.0 }
  0xf2   :  { %v120_v41 = vadd.f32 %v119_v40, %v118_v39 }
  0xf4   :  { %121 = vadd.xlane.f32.xlu0 %v120_v41 }
 0x176   :  { %v134_v42 = vpop.xlane.xlu1 %133 }
 0x177   :  { %v135_v43 = vrot.slane %v134_v42, 4 }
 0x179   :  { %v136_v44 = vadd.f32 %v135_v43, %v134_v42 }
 0x17b   :  { %v137_v45 = vrot.slane %v136_v44, 2 }
 0x17d   :  { %v138_v49 = vadd.f32 %v137_v45, %v136_v44 }
 0x17f   :  { %v139_v52 = vrot.slane %v138_v49, 1 }
 0x181   :  { %v122_v46 = vpop.xlane.xlu0 %121  ;;  %v140_v55 = vadd.f32 %v139_v52, %v138_v49 }
 0x182   :  { %v123_v47 = vrot.slane %v122_v46, 4 }
 0x184   :  { %v124_v48 = vadd.f32 %v123_v47, %v122_v46 }
 0x186   :  { %v125_v50 = vrot.slane %v124_v48, 2 }
 0x188   :  { %v126_v51 = vadd.f32 %v125_v50, %v124_v48 }
 0x18a   :  { %v127_v53 = vrot.slane %v126_v51, 1 }
 0x18c   :  { %v128_v54 = vadd.f32 %v127_v53, %v126_v51 }
 0x18e   :  { %169 = vpush %v128_v54 }
 0x18f   :  { %171 = vpush %v140_v55 }
 0x1bf   :  { %s170_s3 = spop %169 }
 0x1c0   :  { %v145_v58 = vstv %s170_s3  ;;  %s172_s27 = spop %171 }
 0x1c1   :  { %v146_v59 = vsel %vm144_vm1, %v145_v58, 0.0  ;;  %v148_v60 = vstv %s172_s27 }
 0x1c2   :  { %v149_v61 = vsel %vm147_vm2, %v148_v60, 0.0 }
 0x1c3   :  { %v150_v62 = vadd.f32 %v149_v61, %v146_v59 }
 0x1c5   :  { %151 = vst [vmem:[#allocation10] sm:$0xff] %v150_v62 }
 0x1c6   :  { %283 = shalt.err (!%p280_p8)
}
 0x1c7   :  { %s284_s15 = scalar_lea.hbm %s424_s4, 128 }
 0x1c8   :  { %p285_p9 = scmp.ne.s32.totalorder %s424_s4, %s284_s15  ;;  %p288_p10 = scmp.lt.u32.totalorder %s284_s15, %s424_s4 }
 0x1ca   :  { %p290_p11 = pnand %p288_p10, %p285_p9 }
 0x1cc   :  { %293 = shalt.err (!%p290_p11)
}
 0x1cd   :  { %161 = dma.vmem_to_hbm [thread:$0]  %s159_s12, 128, %s424_s4, [#allocation4]  }
 0x1ce   :  { %300 = dma.done.wait [#allocation4], 128  }
 0x1cf   :  { %301 = vsyncadd [#allocation4], 4294967168 }
 0x1d0   :  { %165 = vsyncpa [#allocation3], 1 }
 0x1d1   :  { %166 = vsyncpa [#allocation6], 1 }
 0x1d2   :  { %167 = vsyncpa [#allocation9], 1 }
 0x1d3   :  { %168 = vsyncpa [#allocation4], 1 }

</bundles_post_ra>
